<compile_context>
chip_gen: v7x
topology: tpu7x:2x2x1
jax: 0.10.0
libtpu: 0.0.40
codegen_flags: <defaults>
</compile_context>

<pallas_src>
import functools
from math import sqrt

import jax
import jax.numpy as jnp
from jax import lax
from jax.experimental import pallas as pl
from jax.experimental.pallas import tpu as pltpu


# ----------------------------------------------------------------------------------
# Pallas kernel: per (batch, query-tile) clustered-sparse causal top-k attention over
# all H heads of that batch element.  The sparse (L, K) score matrix of the PyTorch
# module is realised as a (TQ, S) score matrix where every key position NOT selected by
# the query's cluster top-k is -inf, which is identical after the softmax.
# ----------------------------------------------------------------------------------
def _attn_kernel(inf_ref, q_ref, k_ref, v_ref, topk_ref, o_ref, *,
                 num_heads, topk_k, tq):
    n = pl.program_id(0)          # batch index
    qi = pl.program_id(1)         # query-tile index
    S = k_ref.shape[2]
    E = q_ref.shape[3]

    neg_inf = jnp.float32(-jnp.inf)
    q_start = qi * tq
    qpos = q_start + lax.broadcasted_iota(jnp.int32, (tq, 1), 0)     # (TQ, 1) absolute query pos
    key_pos = lax.broadcasted_iota(jnp.int32, (tq, S), 1)            # (TQ, S)
    causal_future = key_pos > qpos                                   # (TQ, S), shared by all heads

    # Per-slot "was +-inf in (head0, cluster0) topk_values" flags, read once from SMEM.
    inf_slot = [inf_ref[n, j] > 0 for j in range(topk_k)]

    for h in range(num_heads):                    # H is small per block -> static unroll
        q = q_ref[0, h]                           # (TQ, E) bf16, pre-scaled by softmax_temp
        k = k_ref[0, h]                           # (S,  E) bf16
        v = v_ref[0, h]                           # (S,  E) bf16
        idx = topk_ref[0, h]                      # (TQ, K) i32 (per-query cluster top-k)

        # q @ k^T on the MXU: bf16 inputs, f32 accumulation (scores already temp-scaled).
        scores = lax.dot_general(q, k, (((1,), (1,)), ((), ())),
                                 preferred_element_type=jnp.float32)    # (TQ, S) f32
        # Hoisted causal fill: every future key position gets -1e7 (matches PyTorch's
        # masked_fill ordering — the causal fill overrides the inf fill at selected slots).
        scores = jnp.where(causal_future, jnp.float32(-1e7), scores)

        # Build the masked logits: selected positions pick up `scores`, everything else -inf.
        # inf-slot & not-future selections must end up -inf, which we get for free by
        # remapping their index to -1 (never matches a key position) on a (TQ,1) array.
        masked = None
        for j in range(topk_k):                   # K small & static -> unrolled
            idx_j = idx[:, j:j + 1]                                    # (TQ, 1)
            skip_j = jnp.logical_and(inf_slot[j], idx_j <= qpos)       # (TQ, 1)
            idx_eff = jnp.where(skip_j, jnp.int32(-1), idx_j)          # (TQ, 1)
            eq_j = key_pos == idx_eff                                  # (TQ, S)
            if masked is None:
                masked = jnp.where(eq_j, scores, neg_inf)              # (TQ, S)
            else:
                masked = jnp.where(eq_j, scores, masked)               # (TQ, S)

        m = jnp.max(masked, axis=-1, keepdims=True)
        p = jnp.exp(masked - m)                                        # unnormalized probs
        denom = jnp.sum(p, axis=-1, keepdims=True)
        # TODO(synk): attention dropout (p=0.1) is identity in eval mode; not applied here.

        out_h = jnp.dot(p.astype(v.dtype), v,
                        preferred_element_type=jnp.float32)            # (TQ, E) f32
        out_h = out_h * pl.reciprocal(denom, approx=True)              # EUP divide, (TQ,E) only
        # Store this head straight into its column slice of the lane-dense output block.
        o_ref[0, :, h * E:(h + 1) * E] = out_h.astype(o_ref.dtype)


def _round_up(x, m):
    return ((x + m - 1) // m) * m


def _pick_query_tile(L, S, H, E, K, out_bytes):
    """S/VMEM-aware query tile (budget sized for the smallest-VMEM generation, v7x)."""
    cap = _round_up(max(L, 8), 8)
    budget = 24 * 1024 * 1024
    for cand in (512, 256, 128, 64, 32, 16, 8):
        if cand > cap:
            continue
        interm = 5 * cand * S * 4                                      # live (TQ,S) f32 arrays
        io = 2 * (H * cand * E * 2 + H * cand * K * 4 + cand * H * E * out_bytes)
        if interm + io <= budget:
            return cand
    return 8


def clustered_causal_topk_attention(q4, k4, v4, topk4, inf_i32, out_dtype):
    """q4/k4/v4: (N, H, L|S, E) bf16 (q pre-scaled by softmax_temp); topk4: (N, H, L, K) i32;
    inf_i32: (N, K) i32.  Returns (N, L, H*E) in out_dtype."""
    N, H, L, E = q4.shape
    S = k4.shape[2]
    K = topk4.shape[-1]
    out_bytes = jnp.dtype(out_dtype).itemsize
    TQ = _pick_query_tile(L, S, H, E, K, out_bytes)

    # Pad L up to a multiple of TQ (padded query rows are sliced off afterwards).
    Lp = _round_up(L, TQ)
    if Lp != L:
        pad = Lp - L
        q4 = jnp.pad(q4, ((0, 0), (0, 0), (0, pad), (0, 0)))
        topk4 = jnp.pad(topk4, ((0, 0), (0, 0), (0, pad), (0, 0)))

    kernel = functools.partial(_attn_kernel, num_heads=H, topk_k=K, tq=TQ)

    grid_spec = pltpu.PrefetchScalarGridSpec(
        num_scalar_prefetch=1,                     # inf mask (N, K) lives in SMEM
        grid=(N, Lp // TQ),
        in_specs=[
            pl.BlockSpec((1, H, TQ, E), lambda n, qi, inf: (n, 0, qi, 0)),
            pl.BlockSpec((1, H, S, E), lambda n, qi, inf: (n, 0, 0, 0)),   # resident over qi
            pl.BlockSpec((1, H, S, E), lambda n, qi, inf: (n, 0, 0, 0)),
            pl.BlockSpec((1, H, TQ, K), lambda n, qi, inf: (n, 0, qi, 0)),
        ],
        out_specs=pl.BlockSpec((1, TQ, H * E), lambda n, qi, inf: (n, qi, 0)),
    )

    # VMEM budget from the real block footprint (K/V resident & double-buffered, q/topk/out
    # double-buffered, plus headroom for the (TQ,S) f32 intermediates).
    kv_resident = 2 * 2 * H * S * E * 2
    step_io = 2 * (H * TQ * E * 2 + H * TQ * K * 4 + TQ * H * E * out_bytes)
    interm = 6 * TQ * S * 4
    vmem_limit = int(min(max(kv_resident + step_io + interm + (8 << 20), 32 << 20), 100 << 20))

    cost = pl.CostEstimate(
        flops=int(4 * N * H * Lp * S * E),
        transcendentals=int(N * H * Lp * S),
        bytes_accessed=int(q4.size * 2 + k4.size * 2 + v4.size * 2 + topk4.size * 4
                           + N * Lp * H * E * out_bytes + N * K * 4),
    )

    out = pl.pallas_call(
        kernel,
        out_shape=jax.ShapeDtypeStruct((N, Lp, H * E), out_dtype),
        grid_spec=grid_spec,
        compiler_params=pltpu.CompilerParams(
            # Megacore split on the batch axis (v7x): splitting qi would duplicate the
            # full-S resident K/V DMA across both TensorCores.
            dimension_semantics=("parallel", "arbitrary"),
            vmem_limit_bytes=vmem_limit,
        ),
        cost_estimate=cost,
    )(inf_i32, q4, k4, v4, topk4)
    return out[:, :L, :]


# ----------------------------------------------------------------------------------
# Plain-JAX glue replacing the fast_transformers clustering / grouping front end.
# ----------------------------------------------------------------------------------
class ImprovedClusteredCausalAttention:
    # attn_mask is assumed lower-triangular and query/key lengths full (no padding).
    def __init__(self, clusters, iterations=10, bits=32, hash_bias=True, topk=32,
                 softmax_temp=None, attention_dropout=0.1, key=None):
        self.clusters = clusters
        self.iterations = iterations
        self.bits = bits
        self.hash_bias = hash_bias
        self.topk = topk
        self.softmax_temp = softmax_temp
        self.attention_dropout = attention_dropout      # identity in eval
        self.key = key if key is not None else jax.random.PRNGKey(0)

    def _compute_hashes(self, Q, planes):
        # Q: (N,H,L,E), planes: (bits, E+1) -> packed hash codes (N,H,L) uint32
        proj = jnp.einsum("nhle,be->nhlb", Q, planes[:, :-1]) + planes[:, -1]
        bits01 = (proj > 0).astype(jnp.uint32)
        powers = jnp.left_shift(jnp.uint32(1), jnp.arange(self.bits, dtype=jnp.uint32))
        return jnp.sum(bits01 * powers, axis=-1, dtype=jnp.uint32)

    def _cluster(self, hashes):
        # Hamming-distance Lloyd/k-means over packed hash codes (full query lengths).
        N, H, L = hashes.shape
        C, bits = self.clusters, self.bits
        init_idx = (jnp.arange(C) * L) // C
        centroids = hashes[:, :, init_idx]                                   # (N,H,C)
        bit_range = jnp.arange(bits, dtype=jnp.uint32)
        point_bits = ((hashes[..., None] >> bit_range) & jnp.uint32(1)).astype(jnp.float32)

        def assign(cent):
            d = lax.population_count(hashes[..., None] ^ cent[..., None, :])  # (N,H,L,C)
            return jnp.argmin(d, axis=-1).astype(jnp.int32)

        def body(_, cent):
            memb = assign(cent)
            onehot = jax.nn.one_hot(memb, C, dtype=jnp.float32)               # (N,H,L,C)
            cnt = jnp.sum(onehot, axis=2)                                     # (N,H,C)
            bit_sums = jnp.einsum("nhlc,nhlb->nhcb", onehot, point_bits)      # (N,H,C,bits)
            maj = (2.0 * bit_sums > cnt[..., None]).astype(jnp.uint32)
            new_cent = jnp.sum(maj << bit_range, axis=-1, dtype=jnp.uint32)
            return jnp.where(cnt > 0, new_cent, cent)

        centroids = lax.fori_loop(0, self.iterations, body, centroids)
        clusters = assign(centroids)                                          # (N,H,L)
        counts = jnp.sum(jax.nn.one_hot(clusters, C, dtype=jnp.int32), axis=2)
        return clusters, counts

    def _prepare(self, queries, keys, values):
        # queries/keys/values: (N, L, H, E)
        q = jnp.transpose(queries, (0, 2, 1, 3)).astype(jnp.float32)          # (N,H,L,E)
        k = jnp.transpose(keys, (0, 2, 1, 3)).astype(jnp.float32)
        v = jnp.transpose(values, (0, 2, 1, 3)).astype(jnp.float32)
        N, H, L, E = q.shape
        S = k.shape[2]
        temp = self.softmax_temp or 1.0 / sqrt(E)

        # Random hyperplanes (drawn at forward time in the PyTorch module).
        planes = jax.random.normal(self.key, (self.bits, E + 1), dtype=jnp.float32)
        if not self.hash_bias:
            planes = planes.at[:, -1].set(0.0)
        hashes = self._compute_hashes(q, planes)
        clusters, counts = self._cluster(hashes)

        # _GroupQueries: per-cluster mean of the member queries.
        onehot = jax.nn.one_hot(clusters, self.clusters, dtype=jnp.float32)   # (N,H,L,C)
        factors = jnp.where(counts > 0, 1.0 / counts.astype(jnp.float32), 0.0)
        q_grouped = jnp.einsum("nhlc,nhle->nhce", onehot, q) * factors[..., None]

        # Centroid / key scores (+ zero additive key-length mask) and top-k keys.
        qk_g = jnp.einsum("nhce,nhse->nhcs", q_grouped, k)                    # (N,H,C,S)
        topk_values, topk_idx = lax.top_k(qk_g, self.topk)                    # (N,H,C,k)

        # Same quirk as the PyTorch code: inf mask comes from (head 0, cluster 0) values.
        inf_i32 = jnp.isinf(topk_values[:, 0, 0, :]).astype(jnp.int32)        # (N, k)

        # _BroadcastValues-style broadcast of each cluster's top-k to its member queries.
        topk_b = jax.vmap(jax.vmap(lambda t, c: t[c]))(topk_idx, clusters)    # (N,H,L,k)

        return dict(
            q4=q.astype(jnp.bfloat16),                        # unscaled (reference path)
            q4_scaled=(q * temp).astype(jnp.bfloat16),        # temp folded in for the kernel
            k4=k.astype(jnp.bfloat16),
            v4=v.astype(jnp.bfloat16),
            topk4=topk_b.astype(jnp.int32),
            inf_i32=inf_i32,
            temp=temp,
            dims=(N, H, L, E),
            out_dtype=queries.dtype,
        )

    def __call__(self, queries, keys, values):
        p = self._prepare(queries, keys, values)
        N, H, L, E = p["dims"]
        out_flat = clustered_causal_topk_attention(
            p["q4_scaled"], p["k4"], p["v4"], p["topk4"], p["inf_i32"], p["out_dtype"]
        )                                                                     # (N, L, H*E)
        return out_flat.reshape(N, L, H, E)


# ----------------------------------------------------------------------------------
# Pure-JAX reference of the sparse top-k causal attention path (mirrors PyTorch code:
# temp applied to the masked QK, exact division).  Uses the same bf16-rounded inputs
# the kernel sees so errors are apples-to-apples.
# ----------------------------------------------------------------------------------
def reference_attention(q4, k4, v4, topk4, inf_i32, temp):
    N, H, L, E = q4.shape
    q = q4.astype(jnp.float32).reshape(N * H, L, E)
    k = k4.astype(jnp.float32).reshape(N * H, -1, E)
    v = v4.astype(jnp.float32).reshape(N * H, -1, E)
    tk = topk4.reshape(N * H, L, -1)
    inf_rows = jnp.repeat(inf_i32, H, axis=0)                                 # (N*H, K)

    def per_head(qh, kh, vh, tkh, inf_row):
        Lh = qh.shape[0]
        kg = kh[tkh]                                                          # (L, K, E)
        vg = vh[tkh]
        qk = jnp.einsum("le,lke->lk", qh, kg)
        qk = jnp.where(inf_row[None, :] > 0, -jnp.inf, qk)
        qk = jnp.where(tkh > jnp.arange(Lh)[:, None], jnp.float32(-1e7), qk)
        a = jax.nn.softmax(temp * qk, axis=-1)
        return jnp.einsum("lk,lke->le", a, vg)

    out = jax.vmap(per_head)(q, k, v, tk, inf_rows)                           # (N*H, L, E)
    return out.reshape(N, H, L, E)


if __name__ == "__main__":
    key = jax.random.PRNGKey(0)
    kq, kk, kv, kp = jax.random.split(key, 4)
    N, L, H, E = 2, 16, 2, 32

    queries = jax.random.normal(kq, (N, L, H, E), dtype=jnp.float32)
    keys_ = jax.random.normal(kk, (N, L, H, E), dtype=jnp.float32)
    values = jax.random.normal(kv, (N, L, H, E), dtype=jnp.float32)

    attn = ImprovedClusteredCausalAttention(
        clusters=4, iterations=10, bits=32, hash_bias=True, topk=8, key=kp
    )

    out = attn(queries, keys_, values)
    out = jax.block_until_ready(out)
    assert out.shape == (N, L, H, E)

    prep = attn._prepare(queries, keys_, values)
    ref_nhle = reference_attention(
        prep["q4"], prep["k4"], prep["v4"], prep["topk4"], prep["inf_i32"], prep["temp"]
    )
    ref = jnp.transpose(ref_nhle, (0, 2, 1, 3)).astype(out.dtype)             # (N, L, H, E)
    max_err = float(jnp.max(jnp.abs(out.astype(jnp.float32) - ref.astype(jnp.float32))))
    assert jnp.allclose(out.astype(jnp.float32), ref.astype(jnp.float32),
                        atol=3e-2, rtol=3e-2), max_err

    print("KERNEL_OK")
</pallas_src>

<mosaic_0001>
module attributes {stable_mosaic.version = 11 : i64} {
  func.func @_attn_kernel(%arg0: i32, %arg1: i32, %arg2: memref<2x8xi32, #tpu.memory_space<smem>>, %arg3: memref<1x2x16x32xbf16, #tpu.memory_space<vmem>>, %arg4: memref<1x2x16x32xbf16, #tpu.memory_space<vmem>>, %arg5: memref<1x2x16x32xbf16, #tpu.memory_space<vmem>>, %arg6: memref<1x2x16x8xi32, #tpu.memory_space<vmem>>, %arg7: memref<1x16x64xf32, #tpu.memory_space<vmem>>) attributes {dimension_semantics = [#tpu.dimension_semantics<parallel>, #tpu.dimension_semantics<arbitrary>], iteration_bounds = array<i64: 2, 1>, scalar_prefetch = 1 : i64, scratch_operands = 0 : i64, tpu.core_type = #tpu.core_type<tc>, window_params = [{transform_indices = @transform_0, window_bounds = array<i64: 1, 2, 16, 32>}, {transform_indices = @transform_1, window_bounds = array<i64: 1, 2, 16, 32>}, {transform_indices = @transform_2, window_bounds = array<i64: 1, 2, 16, 32>}, {transform_indices = @transform_3, window_bounds = array<i64: 1, 2, 16, 8>}, {transform_indices = @transform_4, window_bounds = array<i64: 1, 16, 64>}]} {
    %c16_i32 = arith.constant 16 : i32
    %0 = arith.muli %arg1, %c16_i32 : i32
    %1 = tpu.iota {dimensions = array<i32: 0>} : vector<16x1xi32>
    %2 = vector.broadcast %0 : i32 to vector<16x1xi32>
    %3 = arith.addi %2, %1 : vector<16x1xi32>
    %4 = tpu.iota {dimensions = array<i32: 1>} : vector<16x16xi32>
    %5 = vector.broadcast %3 : vector<16x1xi32> to vector<16x16xi32>
    %6 = arith.cmpi sgt, %4, %5 : vector<16x16xi32>
    %7 = arith.index_cast %arg0 : i32 to index
    %c0 = arith.constant 0 : index
    %8 = memref.load %arg2[%7, %c0] : memref<2x8xi32, #tpu.memory_space<smem>>
    %c0_i32 = arith.constant 0 : i32
    %9 = arith.cmpi sgt, %8, %c0_i32 : i32
    %10 = arith.index_cast %arg0 : i32 to index
    %c1 = arith.constant 1 : index
    %11 = memref.load %arg2[%10, %c1] : memref<2x8xi32, #tpu.memory_space<smem>>
    %c0_i32_0 = arith.constant 0 : i32
    %12 = arith.cmpi sgt, %11, %c0_i32_0 : i32
    %13 = arith.index_cast %arg0 : i32 to index
    %c2 = arith.constant 2 : index
    %14 = memref.load %arg2[%13, %c2] : memref<2x8xi32, #tpu.memory_space<smem>>
    %c0_i32_1 = arith.constant 0 : i32
    %15 = arith.cmpi sgt, %14, %c0_i32_1 : i32
    %16 = arith.index_cast %arg0 : i32 to index
    %c3 = arith.constant 3 : index
    %17 = memref.load %arg2[%16, %c3] : memref<2x8xi32, #tpu.memory_space<smem>>
    %c0_i32_2 = arith.constant 0 : i32
    %18 = arith.cmpi sgt, %17, %c0_i32_2 : i32
    %19 = arith.index_cast %arg0 : i32 to index
    %c4 = arith.constant 4 : index
    %20 = memref.load %arg2[%19, %c4] : memref<2x8xi32, #tpu.memory_space<smem>>
    %c0_i32_3 = arith.constant 0 : i32
    %21 = arith.cmpi sgt, %20, %c0_i32_3 : i32
    %22 = arith.index_cast %arg0 : i32 to index
    %c5 = arith.constant 5 : index
    %23 = memref.load %arg2[%22, %c5] : memref<2x8xi32, #tpu.memory_space<smem>>
    %c0_i32_4 = arith.constant 0 : i32
    %24 = arith.cmpi sgt, %23, %c0_i32_4 : i32
    %25 = arith.index_cast %arg0 : i32 to index
    %c6 = arith.constant 6 : index
    %26 = memref.load %arg2[%25, %c6] : memref<2x8xi32, #tpu.memory_space<smem>>
    %c0_i32_5 = arith.constant 0 : i32
    %27 = arith.cmpi sgt, %26, %c0_i32_5 : i32
    %28 = arith.index_cast %arg0 : i32 to index
    %c7 = arith.constant 7 : index
    %29 = memref.load %arg2[%28, %c7] : memref<2x8xi32, #tpu.memory_space<smem>>
    %c0_i32_6 = arith.constant 0 : i32
    %30 = arith.cmpi sgt, %29, %c0_i32_6 : i32
    %c0_7 = arith.constant 0 : index
    %c0_8 = arith.constant 0 : index
    %c0_9 = arith.constant 0 : index
    %c0_10 = arith.constant 0 : index
    %31 = vector.load %arg3[%c0_7, %c0_8, %c0_9, %c0_10] : memref<1x2x16x32xbf16, #tpu.memory_space<vmem>>, vector<1x1x16x32xbf16>
    %32 = vector.shape_cast %31 : vector<1x1x16x32xbf16> to vector<16x32xbf16>
    %c0_11 = arith.constant 0 : index
    %c0_12 = arith.constant 0 : index
    %c0_13 = arith.constant 0 : index
    %c0_14 = arith.constant 0 : index
    %33 = vector.load %arg4[%c0_11, %c0_12, %c0_13, %c0_14] : memref<1x2x16x32xbf16, #tpu.memory_space<vmem>>, vector<1x1x16x32xbf16>
    %34 = vector.shape_cast %33 : vector<1x1x16x32xbf16> to vector<16x32xbf16>
    %c0_15 = arith.constant 0 : index
    %c0_16 = arith.constant 0 : index
    %c0_17 = arith.constant 0 : index
    %c0_18 = arith.constant 0 : index
    %35 = vector.load %arg5[%c0_15, %c0_16, %c0_17, %c0_18] : memref<1x2x16x32xbf16, #tpu.memory_space<vmem>>, vector<1x1x16x32xbf16>
    %36 = vector.shape_cast %35 : vector<1x1x16x32xbf16> to vector<16x32xbf16>
    %c0_19 = arith.constant 0 : index
    %c0_20 = arith.constant 0 : index
    %c0_21 = arith.constant 0 : index
    %c0_22 = arith.constant 0 : index
    %37 = vector.load %arg6[%c0_19, %c0_20, %c0_21, %c0_22] : memref<1x2x16x8xi32, #tpu.memory_space<vmem>>, vector<1x1x16x8xi32>
    %38 = vector.shape_cast %37 : vector<1x1x16x8xi32> to vector<16x8xi32>
    %cst = arith.constant dense<0.000000e+00> : vector<16x16xf32>
    %39 = tpu.matmul %32, %34, %cst {dimension_numbers = #tpu.dot_dimension_numbers<[1], [1], [0], [0], [0, 0, 1, 0], [], []>} : vector<16x32xbf16>, vector<16x32xbf16>, vector<16x16xf32> -> vector<16x16xf32>
    %cst_23 = arith.constant -1.000000e+07 : f32
    %40 = vector.broadcast %cst_23 : f32 to vector<16x16xf32>
    %41 = arith.select %6, %40, %39 : vector<16x16xi1>, vector<16x16xf32>
    %42 = vector.extract_strided_slice %38 {offsets = [0, 0], sizes = [16, 1], strides = [1, 1]} : vector<16x8xi32> to vector<16x1xi32>
    %43 = arith.cmpi sle, %42, %3 : vector<16x1xi32>
    %44 = vector.broadcast %9 : i1 to vector<16x1xi1>
    %45 = arith.andi %44, %43 : vector<16x1xi1>
    %c-1_i32 = arith.constant -1 : i32
    %46 = vector.broadcast %c-1_i32 : i32 to vector<16x1xi32>
    %47 = arith.select %45, %46, %42 : vector<16x1xi1>, vector<16x1xi32>
    %48 = vector.broadcast %47 : vector<16x1xi32> to vector<16x16xi32>
    %49 = arith.cmpi eq, %4, %48 : vector<16x16xi32>
    %cst_24 = arith.constant 0xFF800000 : f32
    %50 = vector.broadcast %cst_24 : f32 to vector<16x16xf32>
    %51 = arith.select %49, %41, %50 : vector<16x16xi1>, vector<16x16xf32>
    %52 = vector.extract_strided_slice %38 {offsets = [0, 1], sizes = [16, 1], strides = [1, 1]} : vector<16x8xi32> to vector<16x1xi32>
    %53 = arith.cmpi sle, %52, %3 : vector<16x1xi32>
    %54 = vector.broadcast %12 : i1 to vector<16x1xi1>
    %55 = arith.andi %54, %53 : vector<16x1xi1>
    %c-1_i32_25 = arith.constant -1 : i32
    %56 = vector.broadcast %c-1_i32_25 : i32 to vector<16x1xi32>
    %57 = arith.select %55, %56, %52 : vector<16x1xi1>, vector<16x1xi32>
    %58 = vector.broadcast %57 : vector<16x1xi32> to vector<16x16xi32>
    %59 = arith.cmpi eq, %4, %58 : vector<16x16xi32>
    %60 = arith.select %59, %41, %51 : vector<16x16xi1>, vector<16x16xf32>
    %61 = vector.extract_strided_slice %38 {offsets = [0, 2], sizes = [16, 1], strides = [1, 1]} : vector<16x8xi32> to vector<16x1xi32>
    %62 = arith.cmpi sle, %61, %3 : vector<16x1xi32>
    %63 = vector.broadcast %15 : i1 to vector<16x1xi1>
    %64 = arith.andi %63, %62 : vector<16x1xi1>
    %c-1_i32_26 = arith.constant -1 : i32
    %65 = vector.broadcast %c-1_i32_26 : i32 to vector<16x1xi32>
    %66 = arith.select %64, %65, %61 : vector<16x1xi1>, vector<16x1xi32>
    %67 = vector.broadcast %66 : vector<16x1xi32> to vector<16x16xi32>
    %68 = arith.cmpi eq, %4, %67 : vector<16x16xi32>
    %69 = arith.select %68, %41, %60 : vector<16x16xi1>, vector<16x16xf32>
    %70 = vector.extract_strided_slice %38 {offsets = [0, 3], sizes = [16, 1], strides = [1, 1]} : vector<16x8xi32> to vector<16x1xi32>
    %71 = arith.cmpi sle, %70, %3 : vector<16x1xi32>
    %72 = vector.broadcast %18 : i1 to vector<16x1xi1>
    %73 = arith.andi %72, %71 : vector<16x1xi1>
    %c-1_i32_27 = arith.constant -1 : i32
    %74 = vector.broadcast %c-1_i32_27 : i32 to vector<16x1xi32>
    %75 = arith.select %73, %74, %70 : vector<16x1xi1>, vector<16x1xi32>
    %76 = vector.broadcast %75 : vector<16x1xi32> to vector<16x16xi32>
    %77 = arith.cmpi eq, %4, %76 : vector<16x16xi32>
    %78 = arith.select %77, %41, %69 : vector<16x16xi1>, vector<16x16xf32>
    %79 = vector.extract_strided_slice %38 {offsets = [0, 4], sizes = [16, 1], strides = [1, 1]} : vector<16x8xi32> to vector<16x1xi32>
    %80 = arith.cmpi sle, %79, %3 : vector<16x1xi32>
    %81 = vector.broadcast %21 : i1 to vector<16x1xi1>
    %82 = arith.andi %81, %80 : vector<16x1xi1>
    %c-1_i32_28 = arith.constant -1 : i32
    %83 = vector.broadcast %c-1_i32_28 : i32 to vector<16x1xi32>
    %84 = arith.select %82, %83, %79 : vector<16x1xi1>, vector<16x1xi32>
    %85 = vector.broadcast %84 : vector<16x1xi32> to vector<16x16xi32>
    %86 = arith.cmpi eq, %4, %85 : vector<16x16xi32>
    %87 = arith.select %86, %41, %78 : vector<16x16xi1>, vector<16x16xf32>
    %88 = vector.extract_strided_slice %38 {offsets = [0, 5], sizes = [16, 1], strides = [1, 1]} : vector<16x8xi32> to vector<16x1xi32>
    %89 = arith.cmpi sle, %88, %3 : vector<16x1xi32>
    %90 = vector.broadcast %24 : i1 to vector<16x1xi1>
    %91 = arith.andi %90, %89 : vector<16x1xi1>
    %c-1_i32_29 = arith.constant -1 : i32
    %92 = vector.broadcast %c-1_i32_29 : i32 to vector<16x1xi32>
    %93 = arith.select %91, %92, %88 : vector<16x1xi1>, vector<16x1xi32>
    %94 = vector.broadcast %93 : vector<16x1xi32> to vector<16x16xi32>
    %95 = arith.cmpi eq, %4, %94 : vector<16x16xi32>
    %96 = arith.select %95, %41, %87 : vector<16x16xi1>, vector<16x16xf32>
    %97 = vector.extract_strided_slice %38 {offsets = [0, 6], sizes = [16, 1], strides = [1, 1]} : vector<16x8xi32> to vector<16x1xi32>
    %98 = arith.cmpi sle, %97, %3 : vector<16x1xi32>
    %99 = vector.broadcast %27 : i1 to vector<16x1xi1>
    %100 = arith.andi %99, %98 : vector<16x1xi1>
    %c-1_i32_30 = arith.constant -1 : i32
    %101 = vector.broadcast %c-1_i32_30 : i32 to vector<16x1xi32>
    %102 = arith.select %100, %101, %97 : vector<16x1xi1>, vector<16x1xi32>
    %103 = vector.broadcast %102 : vector<16x1xi32> to vector<16x16xi32>
    %104 = arith.cmpi eq, %4, %103 : vector<16x16xi32>
    %105 = arith.select %104, %41, %96 : vector<16x16xi1>, vector<16x16xf32>
    %106 = vector.extract_strided_slice %38 {offsets = [0, 7], sizes = [16, 1], strides = [1, 1]} : vector<16x8xi32> to vector<16x1xi32>
    %107 = arith.cmpi sle, %106, %3 : vector<16x1xi32>
    %108 = vector.broadcast %30 : i1 to vector<16x1xi1>
    %109 = arith.andi %108, %107 : vector<16x1xi1>
    %c-1_i32_31 = arith.constant -1 : i32
    %110 = vector.broadcast %c-1_i32_31 : i32 to vector<16x1xi32>
    %111 = arith.select %109, %110, %106 : vector<16x1xi1>, vector<16x1xi32>
    %112 = vector.broadcast %111 : vector<16x1xi32> to vector<16x16xi32>
    %113 = arith.cmpi eq, %4, %112 : vector<16x16xi32>
    %114 = arith.select %113, %41, %105 : vector<16x16xi1>, vector<16x16xf32>
    %cst_32 = arith.constant dense<0xFF800000> : vector<16xf32>
    %115 = vector.multi_reduction <maximumf>, %114, %cst_32 [1] : vector<16x16xf32> to vector<16xf32>
    %116 = vector.shape_cast %115 : vector<16xf32> to vector<16x1xf32>
    %117 = vector.broadcast %116 : vector<16x1xf32> to vector<16x16xf32>
    %118 = arith.subf %114, %117 : vector<16x16xf32>
    %119 = math.exp %118 : vector<16x16xf32>
    %cst_33 = arith.constant dense<0.000000e+00> : vector<16xf32>
    %120 = vector.multi_reduction <add>, %119, %cst_33 [1] : vector<16x16xf32> to vector<16xf32>
    %121 = vector.shape_cast %120 : vector<16xf32> to vector<16x1xf32>
    %122 = arith.truncf %119 : vector<16x16xf32> to vector<16x16xbf16>
    %cst_34 = arith.constant dense<0.000000e+00> : vector<16x32xf32>
    %123 = tpu.matmul %122, %36, %cst_34 {dimension_numbers = #tpu.dot_dimension_numbers<[1], [0], [0], [1], [0, 0, 1, 1], [], []>} : vector<16x16xbf16>, vector<16x32xbf16>, vector<16x32xf32> -> vector<16x32xf32>
    %124 = tpu.reciprocal %121 {approx = true} : vector<16x1xf32> -> vector<16x1xf32>
    %125 = vector.broadcast %124 : vector<16x1xf32> to vector<16x32xf32>
    %126 = arith.mulf %123, %125 : vector<16x32xf32>
    %c0_35 = arith.constant 0 : index
    %c0_36 = arith.constant 0 : index
    %c0_37 = arith.constant 0 : index
    %127 = vector.load %arg7[%c0_35, %c0_36, %c0_37] : memref<1x16x64xf32, #tpu.memory_space<vmem>>, vector<1x16x32xf32>
    %128 = vector.shape_cast %127 : vector<1x16x32xf32> to vector<16x32xf32>
    %129 = vector.shape_cast %126 : vector<16x32xf32> to vector<1x16x32xf32>
    tpu.vector_store %arg7[%c0_35, %c0_36, %c0_37], %129 {strides = array<i32>} : memref<1x16x64xf32, #tpu.memory_space<vmem>>, vector<1x16x32xf32>,
    %c0_38 = arith.constant 0 : index
    %c1_39 = arith.constant 1 : index
    %c0_40 = arith.constant 0 : index
    %c0_41 = arith.constant 0 : index
    %130 = vector.load %arg3[%c0_38, %c1_39, %c0_40, %c0_41] : memref<1x2x16x32xbf16, #tpu.memory_space<vmem>>, vector<1x1x16x32xbf16>
    %131 = vector.shape_cast %130 : vector<1x1x16x32xbf16> to vector<16x32xbf16>
    %c0_42 = arith.constant 0 : index
    %c1_43 = arith.constant 1 : index
    %c0_44 = arith.constant 0 : index
    %c0_45 = arith.constant 0 : index
    %132 = vector.load %arg4[%c0_42, %c1_43, %c0_44, %c0_45] : memref<1x2x16x32xbf16, #tpu.memory_space<vmem>>, vector<1x1x16x32xbf16>
    %133 = vector.shape_cast %132 : vector<1x1x16x32xbf16> to vector<16x32xbf16>
    %c0_46 = arith.constant 0 : index
    %c1_47 = arith.constant 1 : index
    %c0_48 = arith.constant 0 : index
    %c0_49 = arith.constant 0 : index
    %134 = vector.load %arg5[%c0_46, %c1_47, %c0_48, %c0_49] : memref<1x2x16x32xbf16, #tpu.memory_space<vmem>>, vector<1x1x16x32xbf16>
    %135 = vector.shape_cast %134 : vector<1x1x16x32xbf16> to vector<16x32xbf16>
    %c0_50 = arith.constant 0 : index
    %c1_51 = arith.constant 1 : index
    %c0_52 = arith.constant 0 : index
    %c0_53 = arith.constant 0 : index
    %136 = vector.load %arg6[%c0_50, %c1_51, %c0_52, %c0_53] : memref<1x2x16x8xi32, #tpu.memory_space<vmem>>, vector<1x1x16x8xi32>
    %137 = vector.shape_cast %136 : vector<1x1x16x8xi32> to vector<16x8xi32>
    %cst_54 = arith.constant dense<0.000000e+00> : vector<16x16xf32>
    %138 = tpu.matmul %131, %133, %cst_54 {dimension_numbers = #tpu.dot_dimension_numbers<[1], [1], [0], [0], [0, 0, 1, 0], [], []>} : vector<16x32xbf16>, vector<16x32xbf16>, vector<16x16xf32> -> vector<16x16xf32>
    %cst_55 = arith.constant -1.000000e+07 : f32
    %139 = vector.broadcast %cst_55 : f32 to vector<16x16xf32>
    %140 = arith.select %6, %139, %138 : vector<16x16xi1>, vector<16x16xf32>
    %141 = vector.extract_strided_slice %137 {offsets = [0, 0], sizes = [16, 1], strides = [1, 1]} : vector<16x8xi32> to vector<16x1xi32>
    %142 = arith.cmpi sle, %141, %3 : vector<16x1xi32>
    %143 = vector.broadcast %9 : i1 to vector<16x1xi1>
    %144 = arith.andi %143, %142 : vector<16x1xi1>
    %c-1_i32_56 = arith.constant -1 : i32
    %145 = vector.broadcast %c-1_i32_56 : i32 to vector<16x1xi32>
    %146 = arith.select %144, %145, %141 : vector<16x1xi1>, vector<16x1xi32>
    %147 = vector.broadcast %146 : vector<16x1xi32> to vector<16x16xi32>
    %148 = arith.cmpi eq, %4, %147 : vector<16x16xi32>
    %cst_57 = arith.constant 0xFF800000 : f32
    %149 = vector.broadcast %cst_57 : f32 to vector<16x16xf32>
    %150 = arith.select %148, %140, %149 : vector<16x16xi1>, vector<16x16xf32>
    %151 = vector.extract_strided_slice %137 {offsets = [0, 1], sizes = [16, 1], strides = [1, 1]} : vector<16x8xi32> to vector<16x1xi32>
    %152 = arith.cmpi sle, %151, %3 : vector<16x1xi32>
    %153 = vector.broadcast %12 : i1 to vector<16x1xi1>
    %154 = arith.andi %153, %152 : vector<16x1xi1>
    %c-1_i32_58 = arith.constant -1 : i32
    %155 = vector.broadcast %c-1_i32_58 : i32 to vector<16x1xi32>
    %156 = arith.select %154, %155, %151 : vector<16x1xi1>, vector<16x1xi32>
    %157 = vector.broadcast %156 : vector<16x1xi32> to vector<16x16xi32>
    %158 = arith.cmpi eq, %4, %157 : vector<16x16xi32>
    %159 = arith.select %158, %140, %150 : vector<16x16xi1>, vector<16x16xf32>
    %160 = vector.extract_strided_slice %137 {offsets = [0, 2], sizes = [16, 1], strides = [1, 1]} : vector<16x8xi32> to vector<16x1xi32>
    %161 = arith.cmpi sle, %160, %3 : vector<16x1xi32>
    %162 = vector.broadcast %15 : i1 to vector<16x1xi1>
    %163 = arith.andi %162, %161 : vector<16x1xi1>
    %c-1_i32_59 = arith.constant -1 : i32
    %164 = vector.broadcast %c-1_i32_59 : i32 to vector<16x1xi32>
    %165 = arith.select %163, %164, %160 : vector<16x1xi1>, vector<16x1xi32>
    %166 = vector.broadcast %165 : vector<16x1xi32> to vector<16x16xi32>
    %167 = arith.cmpi eq, %4, %166 : vector<16x16xi32>
    %168 = arith.select %167, %140, %159 : vector<16x16xi1>, vector<16x16xf32>
    %169 = vector.extract_strided_slice %137 {offsets = [0, 3], sizes = [16, 1], strides = [1, 1]} : vector<16x8xi32> to vector<16x1xi32>
    %170 = arith.cmpi sle, %169, %3 : vector<16x1xi32>
    %171 = vector.broadcast %18 : i1 to vector<16x1xi1>
    %172 = arith.andi %171, %170 : vector<16x1xi1>
    %c-1_i32_60 = arith.constant -1 : i32
    %173 = vector.broadcast %c-1_i32_60 : i32 to vector<16x1xi32>
    %174 = arith.select %172, %173, %169 : vector<16x1xi1>, vector<16x1xi32>
    %175 = vector.broadcast %174 : vector<16x1xi32> to vector<16x16xi32>
    %176 = arith.cmpi eq, %4, %175 : vector<16x16xi32>
    %177 = arith.select %176, %140, %168 : vector<16x16xi1>, vector<16x16xf32>
    %178 = vector.extract_strided_slice %137 {offsets = [0, 4], sizes = [16, 1], strides = [1, 1]} : vector<16x8xi32> to vector<16x1xi32>
    %179 = arith.cmpi sle, %178, %3 : vector<16x1xi32>
    %180 = vector.broadcast %21 : i1 to vector<16x1xi1>
    %181 = arith.andi %180, %179 : vector<16x1xi1>
    %c-1_i32_61 = arith.constant -1 : i32
    %182 = vector.broadcast %c-1_i32_61 : i32 to vector<16x1xi32>
    %183 = arith.select %181, %182, %178 : vector<16x1xi1>, vector<16x1xi32>
    %184 = vector.broadcast %183 : vector<16x1xi32> to vector<16x16xi32>
    %185 = arith.cmpi eq, %4, %184 : vector<16x16xi32>
    %186 = arith.select %185, %140, %177 : vector<16x16xi1>, vector<16x16xf32>
    %187 = vector.extract_strided_slice %137 {offsets = [0, 5], sizes = [16, 1], strides = [1, 1]} : vector<16x8xi32> to vector<16x1xi32>
    %188 = arith.cmpi sle, %187, %3 : vector<16x1xi32>
    %189 = vector.broadcast %24 : i1 to vector<16x1xi1>
    %190 = arith.andi %189, %188 : vector<16x1xi1>
    %c-1_i32_62 = arith.constant -1 : i32
    %191 = vector.broadcast %c-1_i32_62 : i32 to vector<16x1xi32>
    %192 = arith.select %190, %191, %187 : vector<16x1xi1>, vector<16x1xi32>
    %193 = vector.broadcast %192 : vector<16x1xi32> to vector<16x16xi32>
    %194 = arith.cmpi eq, %4, %193 : vector<16x16xi32>
    %195 = arith.select %194, %140, %186 : vector<16x16xi1>, vector<16x16xf32>
    %196 = vector.extract_strided_slice %137 {offsets = [0, 6], sizes = [16, 1], strides = [1, 1]} : vector<16x8xi32> to vector<16x1xi32>
    %197 = arith.cmpi sle, %196, %3 : vector<16x1xi32>
    %198 = vector.broadcast %27 : i1 to vector<16x1xi1>
    %199 = arith.andi %198, %197 : vector<16x1xi1>
    %c-1_i32_63 = arith.constant -1 : i32
    %200 = vector.broadcast %c-1_i32_63 : i32 to vector<16x1xi32>
    %201 = arith.select %199, %200, %196 : vector<16x1xi1>, vector<16x1xi32>
    %202 = vector.broadcast %201 : vector<16x1xi32> to vector<16x16xi32>
    %203 = arith.cmpi eq, %4, %202 : vector<16x16xi32>
    %204 = arith.select %203, %140, %195 : vector<16x16xi1>, vector<16x16xf32>
    %205 = vector.extract_strided_slice %137 {offsets = [0, 7], sizes = [16, 1], strides = [1, 1]} : vector<16x8xi32> to vector<16x1xi32>
    %206 = arith.cmpi sle, %205, %3 : vector<16x1xi32>
    %207 = vector.broadcast %30 : i1 to vector<16x1xi1>
    %208 = arith.andi %207, %206 : vector<16x1xi1>
    %c-1_i32_64 = arith.constant -1 : i32
    %209 = vector.broadcast %c-1_i32_64 : i32 to vector<16x1xi32>
    %210 = arith.select %208, %209, %205 : vector<16x1xi1>, vector<16x1xi32>
    %211 = vector.broadcast %210 : vector<16x1xi32> to vector<16x16xi32>
    %212 = arith.cmpi eq, %4, %211 : vector<16x16xi32>
    %213 = arith.select %212, %140, %204 : vector<16x16xi1>, vector<16x16xf32>
    %cst_65 = arith.constant dense<0xFF800000> : vector<16xf32>
    %214 = vector.multi_reduction <maximumf>, %213, %cst_65 [1] : vector<16x16xf32> to vector<16xf32>
    %215 = vector.shape_cast %214 : vector<16xf32> to vector<16x1xf32>
    %216 = vector.broadcast %215 : vector<16x1xf32> to vector<16x16xf32>
    %217 = arith.subf %213, %216 : vector<16x16xf32>
    %218 = math.exp %217 : vector<16x16xf32>
    %cst_66 = arith.constant dense<0.000000e+00> : vector<16xf32>
    %219 = vector.multi_reduction <add>, %218, %cst_66 [1] : vector<16x16xf32> to vector<16xf32>
    %220 = vector.shape_cast %219 : vector<16xf32> to vector<16x1xf32>
    %221 = arith.truncf %218 : vector<16x16xf32> to vector<16x16xbf16>
    %cst_67 = arith.constant dense<0.000000e+00> : vector<16x32xf32>
    %222 = tpu.matmul %221, %135, %cst_67 {dimension_numbers = #tpu.dot_dimension_numbers<[1], [0], [0], [1], [0, 0, 1, 1], [], []>} : vector<16x16xbf16>, vector<16x32xbf16>, vector<16x32xf32> -> vector<16x32xf32>
    %223 = tpu.reciprocal %220 {approx = true} : vector<16x1xf32> -> vector<16x1xf32>
    %224 = vector.broadcast %223 : vector<16x1xf32> to vector<16x32xf32>
    %225 = arith.mulf %222, %224 : vector<16x32xf32>
    %c0_68 = arith.constant 0 : index
    %c0_69 = arith.constant 0 : index
    %c32 = arith.constant 32 : index
    %226 = vector.load %arg7[%c0_68, %c0_69, %c32] : memref<1x16x64xf32, #tpu.memory_space<vmem>>, vector<1x16x32xf32>
    %227 = vector.shape_cast %226 : vector<1x16x32xf32> to vector<16x32xf32>
    %228 = vector.shape_cast %225 : vector<16x32xf32> to vector<1x16x32xf32>
    tpu.vector_store %arg7[%c0_68, %c0_69, %c32], %228 {strides = array<i32>} : memref<1x16x64xf32, #tpu.memory_space<vmem>>, vector<1x16x32xf32>,
    return
  }
  func.func @transform_0(%arg0: i32, %arg1: i32, %arg2: memref<2x8xi32, #tpu.memory_space<smem>>) -> (i32, i32, i32, i32) {
    %c0_i32 = arith.constant 0 : i32
    %c0_i32_0 = arith.constant 0 : i32
    %c0_i32_1 = arith.constant 0 : i32
    return %arg0, %c0_i32, %arg1, %c0_i32_0 : i32, i32, i32, i32
  }
  func.func @transform_1(%arg0: i32, %arg1: i32, %arg2: memref<2x8xi32, #tpu.memory_space<smem>>) -> (i32, i32, i32, i32) {
    %c0_i32 = arith.constant 0 : i32
    %c0_i32_0 = arith.constant 0 : i32
    %c0_i32_1 = arith.constant 0 : i32
    %c0_i32_2 = arith.constant 0 : i32
    return %arg0, %c0_i32, %c0_i32_0, %c0_i32_1 : i32, i32, i32, i32
  }
  func.func @transform_2(%arg0: i32, %arg1: i32, %arg2: memref<2x8xi32, #tpu.memory_space<smem>>) -> (i32, i32, i32, i32) {
    %c0_i32 = arith.constant 0 : i32
    %c0_i32_0 = arith.constant 0 : i32
    %c0_i32_1 = arith.constant 0 : i32
    %c0_i32_2 = arith.constant 0 : i32
    return %arg0, %c0_i32, %c0_i32_0, %c0_i32_1 : i32, i32, i32, i32
  }
  func.func @transform_3(%arg0: i32, %arg1: i32, %arg2: memref<2x8xi32, #tpu.memory_space<smem>>) -> (i32, i32, i32, i32) {
    %c0_i32 = arith.constant 0 : i32
    %c0_i32_0 = arith.constant 0 : i32
    %c0_i32_1 = arith.constant 0 : i32
    return %arg0, %c0_i32, %arg1, %c0_i32_0 : i32, i32, i32, i32
  }
  func.func @transform_4(%arg0: i32, %arg1: i32, %arg2: memref<2x8xi32, #tpu.memory_space<smem>>) -> (i32, i32, i32) {
    %c0_i32 = arith.constant 0 : i32
    %c0_i32_0 = arith.constant 0 : i32
    return %arg0, %arg1, %c0_i32 : i32, i32, i32
  }
}

</mosaic_0001>

<bundles_post_ra>
// kernel: tpu_custom_call.1
= control target key start
LH: loop header
LB: loop body
LE: loop exit
PB: predicated region body
PF: predicated region fallthrough
CT: control target
= control target key end

     0   :  { %s1877_s0 = inlined_call_operand.hbm [shape: s32[2,8], index: 0, kind: input, shape index: {}]   ;;  %s1878_s1 = inlined_call_operand.vmem [shape: bf16[2,2,16,32], index: 1, kind: input, shape index: {}]   ;;  %s1879_s2 = inlined_call_operand.vmem [shape: bf16[2,2,16,32], index: 2, kind: input, shape index: {}]   ;;  %s1880_s3 = inlined_call_operand.vmem [shape: bf16[2,2,16,32], index: 3, kind: input, shape index: {}]   ;;  %s1881_s4 = inlined_call_operand.vmem [shape: s32[2,2,16,8], index: 4, kind: input, shape index: {}]   ;;  %s1882_s5 = inlined_call_operand.hbm [shape: f32[2,16,64], index: 5, kind: output, shape index: {}]  }
   0x1   :  { %s1222_s20 = scalar_lea.hbm %s1877_s0, 32 }
   0x2   :  { %p1223_p0 = scmp.ne.s32.totalorder %s1877_s0, %s1222_s20  ;;  %p1226_p1 = scmp.lt.u32.totalorder %s1222_s20, %s1877_s0 }
   0x4   :  { %p1228_p2 = pnand %p1226_p1, %p1223_p0 }
   0x6   :  { %1231 = shalt.err (!%p1228_p2)  }
   0x7   :  { %s1314_s25 = smov [#allocation3]  }
   0x8   :  { %11 = dma.hbm_to_smem %s1877_s0, 32, %s1314_s25, [#allocation2] }
   0x9   :  { %1284 = dma.done.wait [#allocation2], 32 }
   0xa   :  { %1285 = vsyncadd [#allocation2], 4294967264 }
   0xb   :  { %13 = sfence }
   0xc   :  { %14 = vsyncpa [#allocation5], 0 }
   0xd   :  { %16 = vsyncpa [#allocation5 + $0x1], 0  ;;  %s1371_s28 = smov 0   ;;  %s1373_s29 = smov 0  }
   0xe   :  { %s1375_s30 = smov 0   ;;  %s1377_s6 = smov 0  }
   0xf   :  { %s1379_s7 = smov 0   ;;  %s1381_s8 = smov 0  }
  0x10 LB: > { %s1032_s0 = sadd.s32 4294967295, %s1312_s8   ;;  %s1033_s9 = sadd.s32 4294967294, %s1312_s8   ;;  %s1312_s8 = sphi %s1381_s8, %s22_s8   ;;  %s1308_s7 = sphi %s1379_s7, %s1940_s7   ;;  %s1304_s6 = sphi %s1377_s6, %s1939_s6   ;;  %s1300_s30 = sphi %s1375_s30, %s1938_s30   ;;  %s1296_s29 = sphi %s1373_s29, %s1937_s29   ;;  %s1292_s28 = sphi %s1371_s28, %s1936_s28  }
  0x11   : > { %s34_s10 = sadd.s32 1, %s1308_s7  ;;  %s151_s11 = sadd.s32 1, %s1300_s30 }
  0x12   : > { %p36_p3 = scmp.ge.s32.totalorder %s34_s10, 2  ;;  %p161_p4 = scmp.ne.s32.totalorder %s1300_s30, %s1296_s29 }
  0x13   : > { %p162_p5 = scmp.eq.s32.totalorder %s1032_s0, 1  ;;  %p167_p6 = scmp.ne.s32.totalorder %s1296_s29, %s1292_s28 }
  0x14   : > { %s1942_s10 = smov (%p36_p3, %s34_s10), 0  ;;  %p168_p8 = scmp.eq.s32.totalorder %s1033_s9, 1 }
  0x15   : > { %p1411_p7 = por %p162_p5, %p161_p4  ;;  %s146_s13 = ssub.s32 %s1308_s7, %s1942_s10 }
  0x16   : > { %p1036_p9 = scmp.ge.s32.totalorder %s1312_s8, 1  ;;  %p149_p10 = scmp.eq.s32.totalorder %s146_s13, 0 }
  0x17   : > { %p1418_p11 = por %p168_p8, %p167_p6  ;;  %p228_p12 = scmp.lt.s32.totalorder %s1312_s8, 3 }
  0x18   : > { %s1424_s15 = scalar_select %p149_p10, %s1300_s30, %s151_s11  }
  0x19   : > { %p229_p13 = pnand %p1036_p9, %p228_p12 }
  0x1a   : > { %p278_p0 = scmp.lt.s32.totalorder (!%p229_p13), %s1304_s6, 1  ;;  %s1428_s16 = sshll.u32 (!%p229_p13), %s1304_s6, 7  ;;  %v1315_v0 = vmov (!%p229_p13), 0.0   ;;  %vm1883_vm0 = vmmov (!%p229_p13), 0   ;;  %v310_v1 = vlaneseq (!%p229_p13)  ;;  %v1317_v2 = vmov (!%p229_p13), 1  }
  0x1b   : > { %232 = sbr.rel (%p229_p13) target bundleno = 1167 (0x48f), region = 36  ;;  %1083 = vmatprep.subr.bf16.mxu0 (!%p229_p13), %v1315_v0  ;;  %1085 = vmatprep.mubr.msk.bf16.mxu0 (!%p229_p13), %vm1883_vm0, %v1315_v0  ;;  %s323_s17 = sadd.s32 (!%p229_p13), 1, %s1428_s16  ;;  %v1318_v3 = vmov (!%p229_p13), 0   ;;  %vm1884_vm1 = vcmask (!%p229_p13), 261120   ;;  %v1319_v27 = vmov (!%p229_p13), 2   ;;  %v1320_v31 = vmov (!%p229_p13), 3  }
  0x1c   : > { %s326_s18 = sadd.s32 (!%p229_p13), 2, %s1428_s16  ;;  %1177 = vset.pattern.permute.xlu1 (!%p229_p13), %v1317_v2  ;;  %1176 = vset.pattern.permute.xlu0 (!%p229_p13), %v1318_v3  ;;  %s324_s20 = sld [smem:[#allocation3 + %s323_s17]] (!%p229_p13)  ;;  %v1456_v4 = vshrl.u32 (!%p229_p13), %v310_v1, 7  ;;  %v1321_v36 = vmov (!%p229_p13), 4   ;;  %v1909_v40 = vmov (!%p229_p13), 0  ;;  %v1322_v41 = vmov (!%p229_p13), 5  }
  0x1d   : > { %s327_s21 = sld [smem:[#allocation3 + %s326_s18]] (!%p229_p13)  ;;  %1089 = vmatprep.subr.bf16.mxu1 (!%p229_p13), %v1315_v0  ;;  %1091 = vmatprep.mubr.msk.bf16.mxu1 (!%p229_p13), %vm1883_vm0, %v1315_v0  ;;  %s329_s18 = sadd.s32 (!%p229_p13), 3, %s1428_s16  ;;  %v1323_v45 = vmov (!%p229_p13), 6   ;;  %v1911_v46 = vmov (!%p229_p13), 0  ;;  %v1324_v49 = vmov (!%p229_p13), 7   ;;  %v1631_v63 = vand.u32 (!%p229_p13), 127, %v310_v1 }
  0x1e   : > { %s321_s24 = sld [smem:[#allocation3 + %s1428_s16]] (!%p229_p13)  ;;  %v1468_v7 = vadd.s32 (!%p229_p13), 8, %v1456_v4  ;;  %s335_s25 = sadd.s32 (!%p229_p13), 5, %s1428_s16 }
  0x22   : > { %s279_s19 = scalar_select %p278_p0, %s1304_s6, 1 }
  0x23   : > { %p325_p1 = scmp.gt.s32.totalorder %s324_s20, 0  ;;  %p328_p2 = scmp.gt.s32.totalorder %s327_s21, 0 }
  0x24   : > { %s1441_s22 = sshll.u32 %s279_s19, 4  ;;  %s1073_s23 = sshll.u32 %s279_s19, 5 }
  0x25   : > { %s1447_s26 = scalar_lea.vmem %s1878_s1, %s1441_s22  ;;  %s1453_s9 = scalar_lea.vmem %s1879_s2, %s1441_s22 }
  0x26   : > { %s1461_s17 = scalar_lea.vmem %s1881_s4, %s1073_s23  ;;  %v1200_v5 = vld [vmem:[%s1453_s9] sm:$0xff]   ;;  %s330_s19 = sld [smem:[#allocation3 + %s329_s18]] }
  0x27   : > { %v367_v6 = vsel %vm1884_vm1, %v1200_v5, 0  ;;  %v1471_v8 = vld [vmem:[%s1461_s17] sm:$0xff]  ;;  %v1474_v9 = vld [vmem:[%s1461_s17 + $0x8] sm:$0xff]  ;;  %s332_s23 = sadd.s32 4, %s1428_s16  ;;  %p322_p4 = scmp.gt.s32.totalorder %s321_s24, 0 }
  0x28   : > { %1084 = vmatpush3.bf16.xpose.msra.mxu0 %v367_v6  ;;  %s431_s27 = scalar_select %p325_p1, 1, 0  ;;  %v1201_v10 = vld [vmem:[%s1447_s26] sm:$0xff]   ;;  %vm1482_vm2 = vcmp.le.s32.totalorder %v1471_v8, %v1456_v4  ;;  %vm1488_vm3 = vcmp.le.s32.totalorder %v1474_v9, %v1468_v7 }
  0x29   : > { %1101 = vmatprep.subr.bf16.mxu0 %v1315_v0  ;;  %s448_s0 = scalar_select %p328_p2, 1, 0 }
  0x2a   : > { %v432_v12 = vstv %s431_s27  ;;  %s333_s20 = sld [smem:[#allocation3 + %s332_s23]]  ;;  %s338_s18 = sadd.s32 6, %s1428_s16 }
  0x2b   : > { %vm1492_vm4 = vcmp.eq.s32.totalorder %v432_v12, 1  ;;  %v449_v15 = vstv %s448_s0  ;;  %s1496_s21 = sld [smem:[#allocation3 + %s335_s25]]  ;;  %s341_s23 = sadd.s32 7, %s1428_s16 }
  0x2c   : > { %p331_p3 = scmp.gt.s32.totalorder %s330_s19, 0  ;;  %vm434_vm5 = vmand %vm1492_vm4, %vm1482_vm2  ;;  %vm1508_vm7 = vcmp.eq.s32.totalorder %v449_v15, 1  ;;  %s1528_s19 = sld [smem:[#allocation3 + %s338_s18]] }
  0x2d   : > { %v436_v16 = vsel %vm434_vm5, 4294967295, %v1471_v8  ;;  %vm435_vm6 = vmand %vm1492_vm4, %vm1488_vm3  ;;  %s414_s13 = scalar_select %p322_p4, 1, 0 }
  0x2e   : > { %s465_s11 = scalar_select %p331_p3, 1, 0  ;;  %439 = vperm.xlu1 %1177, %v436_v16   ;;  %v437_v18 = vsel %vm435_vm6, 4294967295, %v1474_v9  ;;  %vm452_vm8 = vmand %vm1508_vm7, %vm1488_vm3 }
  0x2f   : > { %1086 = vmatmul.mubr.msk.bf16.vlgmr.msra.gmra.mrb[0].mxu0 %vm1884_vm1, %v1201_v10  ;;  %v415_v19 = vstv %s414_s13  ;;  %v454_v24 = vsel %vm452_vm8, 4294967295, %v1474_v9  ;;  %vm451_vm13 = vmand %vm1508_vm7, %vm1482_vm2  ;;  %s1552_s25 = sld [smem:[#allocation3 + %s341_s23]]  ;;  %s1074_s13 = sshll.u32 %s1304_s6, 8 }
  0x30   : > { %1103 = vmatprep.mubr.msk.bf16.mxu0 %vm1883_vm0, %v1315_v0  ;;  %v466_v20 = vstv %s465_s11  ;;  %vm1520_vm9 = vcmp.eq.s32.totalorder %v415_v19, 1  ;;  %p334_p5 = scmp.gt.s32.totalorder %s333_s20, 0  ;;  %v453_v30 = vsel %vm451_vm13, 4294967295, %v1471_v8  ;;  %s1673_s11 = scalar_lea.vmem %s1880_s3, %s1441_s22 }
  0x31   : > { %vm417_vm10 = vmand %vm1520_vm9, %vm1482_vm2  ;;  %vm1535_vm12 = vcmp.eq.s32.totalorder %v466_v20, 1  ;;  %p337_p6 = scmp.gt.s32.totalorder %s1496_s21, 0  ;;  %s274_s22 = sand.u32 1, %s1296_s29  }
  0x32   : > { %442 = vperm.xlu1 %1177, %v437_v18   ;;  %v419_v22 = vsel %vm417_vm10, 4294967295, %v1471_v8  ;;  %vm418_vm11 = vmand %vm1520_vm9, %vm1488_vm3  ;;  %s482_s24 = scalar_select %p334_p5, 1, 0 }
  0x33   : > { %422 = vperm.xlu0 %1176, %v419_v22   ;;  %v420_v25 = vsel %vm418_vm11, 4294967295, %v1474_v9  ;;  %vm468_vm14 = vmand %vm1535_vm12, %vm1482_vm2  ;;  %s499_s16 = scalar_select %p337_p6, 1, 0 }
  0x34   : > { %v483_v26 = vstv %s482_s24  ;;  %v470_v29 = vsel %vm468_vm14, 4294967295, %v1471_v8  ;;  %p340_p8 = scmp.gt.s32.totalorder %s1528_s19, 0  ;;  %vm469_vm5 = vmand %vm1535_vm12, %vm1488_vm3  ;;  %s1825_s23 = scalar_lea.hbm %s1882_s5, %s1074_s13 }
  0x35   : > { %vm1554_vm15 = vcmp.eq.s32.totalorder %v483_v26, 1  ;;  %v500_v32 = vstv %s499_s16  ;;  %v471_v34 = vsel %vm469_vm5, 4294967295, %v1474_v9  ;;  %p343_p9 = scmp.gt.s32.totalorder %s1552_s25, 0  ;;  %s1831_s25 = scalar_lea.sflag [#allocation5], %s274_s22 }
  0x36   : > { %1179 = vset.pattern.permute.xlu1 %v1319_v27  ;;  %vm485_vm6 = vmand %vm1554_vm15, %vm1482_vm2  ;;  %s516_s27 = scalar_select %p340_p8, 1, 0  ;;  %vm1577_vm10 = vcmp.eq.s32.totalorder %v500_v32, 1 }
  0x37   : > { %459 = vperm.xlu1 %1179, %v454_v24   ;;  %425 = vperm.xlu0 %1176, %v420_v25   ;;  %v487_v33 = vsel %vm485_vm6, 4294967295, %v1471_v8  ;;  %vm486_vm8 = vmand %vm1554_vm15, %vm1488_vm3  ;;  %s533_s0 = scalar_select %p343_p9, 1, 0 }
  0x38   : > { %vm502_vm11 = vmand %vm1577_vm10, %vm1482_vm2  ;;  %v517_v37 = vstv %s516_s27  ;;  %v488_v38 = vsel %vm486_vm8, 4294967295, %v1474_v9  ;;  %s1326_s16 = smov [#allocation4]  }
  0x39   : > { %v504_v39 = vsel %vm502_vm11, 4294967295, %v1471_v8  ;;  %vm503_vm13 = vmand %vm1577_vm10, %vm1488_vm3  ;;  %vm1594_vm14 = vcmp.eq.s32.totalorder %v517_v37, 1  ;;  %v534_v43 = vstv %s533_s0  ;;  %s1236_s27 = sshll.u32 %s1326_s16, 4  ;;  %s1237_s27 = int_to_ptr.vmem [resolvable:$false] %s1236_s27 }
  0x3a   : > { %v1910_v40 = vsel %vm1594_vm14, 4294967295, %v1909_v40  ;;  %vm520_vm5 = vmand %vm1594_vm14, %vm1488_vm3  ;;  %v505_v42 = vsel %vm503_vm13, 4294967295, %v1474_v9  ;;  %vm1611_vm8 = vcmp.eq.s32.totalorder %v534_v43, 1  ;;  %v1202_v43 = vld [vmem:[%s1673_s11] sm:$0xff]   ;;  %s1238_s0 = scalar_lea.vmem %s1237_s27, 512 }
  0x3b   : > { %1180 = vset.pattern.permute.xlu1 %v1320_v31  ;;  %1178 = vset.pattern.permute.xlu0 %v1319_v27  ;;  %v522_v44 = vsel %vm520_vm5, 4294967295, %v1474_v9  ;;  %vm519_vm6 = vmand %vm1594_vm14, %vm1482_vm2  ;;  %v1912_v46 = vsel %vm1611_vm8, 4294967295, %v1911_v46 }
  0x3c   : > { %473 = vperm.xlu1 %1180, %v470_v29   ;;  %456 = vperm.xlu0 %1178, %v453_v30   ;;  %v521_v47 = vsel %vm519_vm6, 4294967295, %v1471_v8  ;;  %vm536_vm11 = vmand %vm1611_vm8, %vm1482_vm2  ;;  %vm1885_vm2 = vcmp.gt.s32.totalorder %v1631_v63, %v1456_v4 }
  0x3d   : > { %v538_v48 = vsel %vm536_vm11, 4294967295, %v1471_v8  ;;  %vm537_vm13 = vmand %vm1611_vm8, %vm1488_vm3  ;;  %vm1890_vm3 = vcmp.gt.s32.totalorder %v1631_v63, %v1468_v7  ;;  %1090 = vmatpush3.bf16.msra.mxu1 %v1202_v43 }
  0x3e   : > { %v539_v50 = vsel %vm537_vm13, 4294967295, %v1474_v9  ;;  %1095 = vmatprep.subr.bf16.mxu1 %v1315_v0 }
  0x40   : > { %1182 = vset.pattern.permute.xlu1 %v1321_v36  ;;  %1181 = vset.pattern.permute.xlu0 %v1320_v31 }
  0x41   : > { %490 = vperm.xlu1 %1182, %v487_v33   ;;  %476 = vperm.xlu0 %1181, %v471_v34  }
  0x45   : > { %493 = vperm.xlu1 %1182, %v488_v38   ;;  %1183 = vset.pattern.permute.xlu0 %v1322_v41 }
  0x46   : > { %507 = vperm.xlu0 %1183, %v504_v39  }
  0x49   : > { %1184 = vset.pattern.permute.xlu1 %v1322_v41 }
  0x4a   : > { %510 = vperm.xlu1 %1184, %v505_v42   ;;  %1186 = vset.pattern.permute.xlu0 %v1323_v45 }
  0x4b   : > { %527 = vperm.xlu0 %1186, %v522_v44   ;;  %v1058_v44 = vld [vmem:[%s1461_s17 + $0x10] sm:$0xff] }
  0x4e   : > { %1185 = vset.pattern.permute.xlu1 %v1323_v45 }
  0x4f   : > { %524 = vperm.xlu1 %1185, %v521_v47   ;;  %1188 = vset.pattern.permute.xlu0 %v1318_v3  ;;  %v1059_v47 = vld [vmem:[%s1461_s17 + $0x18] sm:$0xff]  ;;  %s1325_s17 = smov 32  }
  0x53   : > { %1187 = vset.pattern.permute.xlu1 %v1324_v49 }
  0x54   : > { %541 = vperm.xlu1 %1187, %v538_v48  }
  0x58   : > { %544 = vperm.xlu1 %1187, %v539_v50  }
  0x5c   : > { %1189 = vset.pattern.permute.xlu1 %v1318_v3 }
  0xad   : > { %v440_v51 = vpop.permute.xlu1 %439 }
  0xae   : > { %vm444_vm6 = vcmp.eq.s32.totalorder %v1631_v63, %v440_v51 }
  0xb1   : > { %v443_v52 = vpop.permute.xlu1 %442 }
  0xb2   : > { %v423_v55 = vpop.permute.xlu0 %422  ;;  %vm445_vm11 = vcmp.eq.s32.totalorder %v1631_v63, %v443_v52 }
  0xb3   : > { %vm427_vm5 = vcmp.eq.s32.totalorder %v1631_v63, %v423_v55 }
  0xb6   : > { %v460_v53 = vpop.permute.xlu1 %459  ;;  %v426_v57 = vpop.permute.xlu0 %425 }
  0xb7   : > { %vm428_vm0 = vcmp.eq.s32.totalorder %v1631_v63, %v426_v57 }
  0xbb   : > { %v474_v54 = vpop.permute.xlu1 %473  ;;  %v457_v59 = vpop.permute.xlu0 %456 }
  0xbc   : > { %vm461_vm1 = vcmp.eq.s32.totalorder %v1631_v63, %v457_v59  ;;  %vm478_vm14 = vcmp.eq.s32.totalorder %v1631_v63, %v474_v54 }
  0xc0   : > { %v491_v56 = vpop.permute.xlu1 %490  ;;  %v477_v61 = vpop.permute.xlu0 %476 }
  0xc1   : > { %vm479_vm13 = vcmp.eq.s32.totalorder %v1631_v63, %v477_v61 }
  0xc4   : > { %v494_v58 = vpop.permute.xlu1 %493 }
  0xc5   : > { %v508_v5 = vpop.permute.xlu0 %507  ;;  %vm496_vm8 = vcmp.eq.s32.totalorder %v1631_v63, %v494_v58 }
  0xc9   : > { %v511_v60 = vpop.permute.xlu1 %510 }
  0xca   : > { %v528_v16 = vpop.permute.xlu0 %527 }
  0xce   : > { %v525_v62 = vpop.permute.xlu1 %524 }
  0xd3   : > { %v542_v8 = vpop.permute.xlu1 %541 }
  0xd7   : > { %v545_v26 = vpop.permute.xlu1 %544 }
 0x102   : > { %v403_v3 = vpop.f32.mrb[0].mxu0 }
 0x103   : > { %v410_v6 = vsel %vm1885_vm2, -10000000.0, %v403_v3  ;;  %v1087_v9 = vpop.f32.mrb[1].mxu0  ;;  %vm462_vm2 = vcmp.eq.s32.totalorder %v1631_v63, %v460_v53 }
 0x104   : > { %v406_v1 = vpop.f32.mrb[2].mxu0  ;;  %v429_v10 = vsel %vm427_vm5, %v410_v6, -inf  ;;  %vm495_vm5 = vcmp.eq.s32.totalorder %v1631_v63, %v491_v56 }
 0x105   : > { %v411_v11 = vsel %vm1890_vm3, -10000000.0, %v406_v1  ;;  %v446_v12 = vsel %vm444_vm6, %v410_v6, %v429_v10  ;;  %v1088_v13 = vpop.f32.mrb[3].mxu0  ;;  %vm512_vm6 = vcmp.eq.s32.totalorder %v1631_v63, %v508_v5  ;;  %vm529_vm3 = vcmp.eq.s32.totalorder %v1631_v63, %v525_v62  ;;  %v1204_v5 = vld [vmem:[%s1447_s26 + $0x8] sm:$0xff]   ;;  %s1037_s26 = sshll.u32 %s274_s22, 4 }
 0x106   : > { %v463_v15 = vsel %vm461_vm1, %v410_v6, %v446_v12  ;;  %v430_v18 = vsel %vm428_vm0, %v411_v11, -inf  ;;  %vm530_vm0 = vcmp.eq.s32.totalorder %v1631_v63, %v528_v16  ;;  %vm513_vm1 = vcmp.eq.s32.totalorder %v1631_v63, %v511_v60  ;;  %v1203_v60 = vld [vmem:[%s1453_s9 + $0x8] sm:$0xff]   ;;  %s276_s9 = scalar_lea.vmem [#allocation4], %s1037_s26 }
 0x107   : > { %v480_v19 = vsel %vm478_vm14, %v410_v6, %v463_v15  ;;  %v447_v20 = vsel %vm445_vm11, %v411_v11, %v430_v18  ;;  %vm546_vm14 = vcmp.eq.s32.totalorder %v1631_v63, %v542_v8  ;;  %vm1913_vm11 = vcmask 130048   ;;  %s911_s18 = sshll.u32 %s276_s9, 4  ;;  %s1827_s18 = int_to_ptr.vmem [resolvable:$true] %s911_s18 }
 0x108   : > { %v497_v22 = vsel %vm495_vm5, %v410_v6, %v480_v19  ;;  %v464_v24 = vsel %vm462_vm2, %v411_v11, %v447_v20  ;;  %vm547_vm2 = vcmp.eq.s32.totalorder %v1631_v63, %v545_v26  ;;  %s1232_s6 = scalar_lea.vmem %s1827_s18, 256  ;;  %p1239_p0 = scmp.lt.s32.totalorder %s1827_s18, %s1237_s27 }
 0x109   : > { %v514_v25 = vsel %vm512_vm6, %v410_v6, %v497_v22  ;;  %v481_v29 = vsel %vm479_vm13, %v411_v11, %v464_v24  ;;  %vm1914_vm13 = vmmov %vm1913_vm11  ;;  %p1233_p10 = scmp.ne.s32.totalorder %s1827_s18, %s1232_s6  ;;  %p1240_p1 = scmp.lt.s32.totalorder %s1238_s0, %s1232_s6 }
 0x10a   : > { %v498_v30 = vsel %vm496_vm8, %v411_v11, %v481_v29  ;;  %v531_v32 = vsel %vm529_vm3, %v410_v6, %v514_v25  ;;  %vm1680_vm8 = vcmp.le.s32.totalorder %v1059_v47, %v1468_v7  ;;  %vm1685_vm3 = vcmp.le.s32.totalorder %v1058_v44, %v1456_v4 }
 0x10b   : > { %v515_v33 = vsel %vm513_vm1, %v411_v11, %v498_v30  ;;  %v1660_v34 = vsel %vm546_vm14, %v410_v6, %v531_v32  ;;  %vm700_vm5 = vmand %vm1520_vm9, %vm1680_vm8  ;;  %p1234_p12 = pnand %p1233_p10, %p1411_p7  ;;  %p1241_p2 = por %p1240_p1, %p1239_p0 }
 0x10c   : > { %v532_v37 = vsel %vm530_vm0, %v411_v11, %v515_v33  ;;  %v551_v38 = vsel %vm1913_vm11, %v1660_v34, -inf  ;;  %v702_v51 = vsel %vm700_vm5, 4294967295, %v1059_v47  ;;  %vm713_vm6 = vmand %vm1492_vm4, %vm1685_vm3 }
 0x10d   : > { %552 = vmax.xlane.f32.xlu0 %v551_v38  ;;  %v1665_v39 = vsel %vm547_vm2, %v411_v11, %v532_v37  ;;  %v715_v52 = vsel %vm713_vm6, 4294967295, %v1058_v44  ;;  %vm714_vm0 = vmand %vm1492_vm4, %vm1680_vm8  ;;  %p1235_p13 = pneg %p1234_p12 }
 0x10e   : > { %v554_v42 = vsel %vm1914_vm13, %v1665_v39, -inf  ;;  %v716_v53 = vsel %vm714_vm0, 4294967295, %v1059_v47  ;;  %vm699_vm1 = vmand %vm1520_vm9, %vm1685_vm3  ;;  %vm1920_vm0 = vnez %v1910_v40 }
 0x10f   : > { %555 = vmax.xlane.f32.xlu1 %v554_v42  ;;  %vm727_vm14 = vmand %vm1508_vm7, %vm1685_vm3  ;;  %v701_v54 = vsel %vm699_vm1, 4294967295, %v1058_v44  ;;  %p1242_p3 = pnand %p1241_p2, %p1235_p13 }
 0x110   : > { %vm755_vm4 = vmand %vm1554_vm15, %vm1685_vm3 }
 0x111   : > { %v757_v14 = vsel %vm755_vm4, 4294967295, %v1058_v44  ;;  %vm728_vm9 = vmand %vm1508_vm7, %vm1680_vm8  ;;  %vm1919_vm7 = vnez %v1912_v46 }
 0x112   : > { %vm770_vm2 = vmand %vm1577_vm10, %vm1680_vm8  ;;  %v730_v21 = vsel %vm728_vm9, 4294967295, %v1059_v47 }
 0x113   : > { %v772_v55 = vsel %vm770_vm2, 4294967295, %v1059_v47  ;;  %vm741_vm11 = vmand %vm1535_vm12, %vm1685_vm3  ;;  %vm1925_vm2 = vcmp.gt.s32.totalorder %v1631_v63, %v1456_v4 }
 0x114   : > { %vm797_vm13 = vmand %vm1919_vm7, %vm1685_vm3  ;;  %v743_v17 = vsel %vm741_vm11, 4294967295, %v1058_v44 }
 0x115   : > { %vm742_vm5 = vmand %vm1535_vm12, %vm1680_vm8 }
 0x116   : > { %v744_v56 = vsel %vm742_vm5, 4294967295, %v1059_v47  ;;  %vm756_vm6 = vmand %vm1554_vm15, %vm1680_vm8 }
 0x117   : > { %v758_v57 = vsel %vm756_vm6, 4294967295, %v1059_v47  ;;  %vm769_vm12 = vmand %vm1577_vm10, %vm1685_vm3  ;;  %vm1926_vm6 = vcmp.gt.s32.totalorder %v1631_v63, %v1468_v7 }
 0x118   : > { %v771_v23 = vsel %vm769_vm12, 4294967295, %v1058_v44  ;;  %vm783_vm1 = vmand %vm1920_vm0, %vm1685_vm3  ;;  %vm1922_vm3 = vcmask 130048  }
 0x119   : > { %v785_v28 = vsel %vm783_vm1, 4294967295, %v1058_v44  ;;  %vm784_vm15 = vmand %vm1920_vm0, %vm1680_vm8 }
 0x11a   : > { %vm798_vm10 = vmand %vm1919_vm7, %vm1680_vm8  ;;  %vm1921_vm8 = vcmask 261120  }
 0x11b   : > { %v800_v35 = vsel %vm798_vm10, 4294967295, %v1059_v47  ;;  %v652_v62 = vsel %vm1921_vm8, %v1203_v60, 0  ;;  %vm1924_vm4 = vmmov %vm1921_vm8 }
 0x120   : > { %707 = vperm.xlu1 %1189, %v702_v51  }
 0x123   : > { %704 = vperm.xlu0 %1188, %v701_v54  }
 0x124   : > { %1190 = vset.pattern.permute.xlu1 %v1317_v2  ;;  %v729_v2 = vsel %vm727_vm14, 4294967295, %v1058_v44  ;;  %vm1923_vm14 = vmmov 0  }
 0x125   : > { %718 = vperm.xlu1 %1190, %v715_v52  }
 0x127   : > { %1193 = vset.pattern.permute.xlu0 %v1321_v36 }
 0x128   : > { %760 = vperm.xlu0 %1193, %v757_v14  }
 0x129   : > { %721 = vperm.xlu1 %1190, %v716_v53  }
 0x12c   : > { %1196 = vset.pattern.permute.xlu0 %v1322_v41 }
 0x12d   : > { %1191 = vset.pattern.permute.xlu1 %v1319_v27  ;;  %777 = vperm.xlu0 %1196, %v772_v55   ;;  %v799_v27 = vsel %vm797_vm13, 4294967295, %v1058_v44 }
 0x12e   : > { %732 = vperm.xlu1 %1191, %v729_v2  }
 0x131   : > { %1198 = vset.pattern.permute.xlu0 %v1324_v49 }
 0x132   : > { %735 = vperm.xlu1 %1191, %v730_v21   ;;  %802 = vperm.xlu0 %1198, %v799_v27   ;;  %v1205_v27 = vld [vmem:[%s1673_s11 + $0x8] sm:$0xff]  }
 0x133   : > { %1102 = vmatpush3.bf16.msra.mxu0 %v1205_v27 }
 0x136   : > { %1192 = vset.pattern.permute.xlu1 %v1320_v31  ;;  %v786_v31 = vsel %vm784_vm15, 4294967295, %v1059_v47 }
 0x137   : > { %746 = vperm.xlu1 %1192, %v743_v17  }
 0x13b   : > { %749 = vperm.xlu1 %1192, %v744_v56  }
 0x13f   : > { %1194 = vset.pattern.permute.xlu1 %v1321_v36 }
 0x140   : > { %763 = vperm.xlu1 %1194, %v758_v57  }
 0x144   : > { %1195 = vset.pattern.permute.xlu1 %v1322_v41 }
 0x145   : > { %774 = vperm.xlu1 %1195, %v771_v23  }
 0x149   : > { %1197 = vset.pattern.permute.xlu1 %v1323_v45 }
 0x14a   : > { %788 = vperm.xlu1 %1197, %v785_v28  }
 0x14e   : > { %791 = vperm.xlu1 %1197, %v786_v31  }
 0x152   : > { %1199 = vset.pattern.permute.xlu1 %v1324_v49 }
 0x153   : > { %805 = vperm.xlu1 %1199, %v800_v35  }
 0x19a   : > { %v553_v36 = vpop.xlane.xlu0 %552 }
 0x19b   : > { %v557_v40 = vsub.f32 %v1660_v34, %v553_v36 }
 0x19c   : > { %v556_v41 = vpop.xlane.xlu1 %555 }
 0x19d   : > { %v559_v58 = vmul.f32 1.442695, %v557_v40  ;;  %v558_v45 = vsub.f32 %v1665_v39, %v556_v41 }
 0x19f   : > { %v561_v59 = vmul.f32 1.442695, %v558_v45  ;;  %1206 = vpow2.f32 %v559_v58 }
 0x1a0   : > { %v708_v3 = vpop.permute.xlu1 %707 }
 0x1a1   : > { %1208 = vpow2.f32 %v561_v59  ;;  %vm710_vm11 = vcmp.eq.s32.totalorder %v1631_v63, %v708_v3 }
 0x1a2   : > { %v705_v13 = vpop.permute.xlu0 %704 }
 0x1a3   : > { %vm709_vm9 = vcmp.eq.s32.totalorder %v1631_v63, %v705_v13 }
 0x1a4   : > { %v719_v6 = vpop.permute.xlu1 %718 }
 0x1a5   : > { %vm723_vm7 = vcmp.eq.s32.totalorder %v1631_v63, %v719_v6 }
 0x1a7   : > { %v761_v16 = vpop.permute.xlu0 %760 }
 0x1a8   : > { %v722_v8 = vpop.permute.xlu1 %721  ;;  %vm765_vm15 = vcmp.eq.s32.totalorder %v1631_v63, %v761_v16 }
 0x1a9   : > { %v1766_v61 = vpop.eup %1206  ;;  %vm724_vm13 = vcmp.eq.s32.totalorder %v1631_v63, %v722_v8 }
 0x1ab   : > { %v1768_v46 = vpop.eup %1208 }
 0x1ac   : > { %v569_v49 = vpack.c.bf16 %v1768_v46, %v1766_v61  ;;  %v778_v24 = vpop.permute.xlu0 %777 }
 0x1ad   : > { %v733_v9 = vpop.permute.xlu1 %732 }
 0x1ae   : > { %1092 = vmatmul.mubr.msk.bf16.vlgmr.msra.gmra.mrb[0].mxu1 %vm1922_vm3, %v569_v49  ;;  %vm737_vm5 = vcmp.eq.s32.totalorder %v1631_v63, %v733_v9 }
 0x1af   : > { %1096 = vmatpush3.bf16.xpose.msra.mxu1 %v652_v62  ;;  %1097 = vmatprep.mubr.msk.bf16.mxu1 %vm1923_vm14, %v1315_v0 }
 0x1b1   : > { %v736_v1 = vpop.permute.xlu1 %735  ;;  %v803_v38 = vpop.permute.xlu0 %802 }
 0x1b2   : > { %vm738_vm12 = vcmp.eq.s32.totalorder %v1631_v63, %v736_v1  ;;  %vm807_vm8 = vcmp.eq.s32.totalorder %v1631_v63, %v803_v38 }
 0x1b6   : > { %1098 = vmatmul.mubr.msk.bf16.vlgmr.msra.gmra.mrb[4].mxu1 %vm1924_vm4, %v1204_v5  ;;  %v747_v10 = vpop.permute.xlu1 %746  ;;  %vm780_vm4 = vcmp.eq.s32.totalorder %v1631_v63, %v778_v24 }
 0x1b7   : > { %vm751_vm0 = vcmp.eq.s32.totalorder %v1631_v63, %v747_v10 }
 0x1ba   : > { %v750_v11 = vpop.permute.xlu1 %749 }
 0x1bb   : > { %vm752_vm1 = vcmp.eq.s32.totalorder %v1631_v63, %v750_v11 }
 0x1bf   : > { %v764_v12 = vpop.permute.xlu1 %763 }
 0x1c0   : > { %vm766_vm3 = vcmp.eq.s32.totalorder %v1631_v63, %v764_v12 }
 0x1c4   : > { %v775_v15 = vpop.permute.xlu1 %774 }
 0x1c5   : > { %vm779_vm10 = vcmp.eq.s32.totalorder %v1631_v63, %v775_v15 }
 0x1c9   : > { %v789_v22 = vpop.permute.xlu1 %788 }
 0x1ca   : > { %vm793_vm14 = vcmp.eq.s32.totalorder %v1631_v63, %v789_v22 }
 0x1cd   : > { %v792_v29 = vpop.permute.xlu1 %791 }
 0x1d2   : > { %v806_v44 = vpop.permute.xlu1 %805 }
 0x281   : > { %v1778_v18 = vpop.f32.mrb[0].mxu1 }
 0x282   : > { %v1093_v19 = vpop.f32.mrb[1].mxu1 }
 0x283   : > { %v1780_v20 = vpop.f32.mrb[2].mxu1 }
 0x284   : > { %v1094_v0 = vpop.f32.mrb[3].mxu1 }
 0x289   : > { %v688_v25 = vpop.f32.mrb[4].mxu1 }
 0x28a   : > { %v695_v26 = vsel %vm1925_vm2, -10000000.0, %v688_v25  ;;  %v1099_v30 = vpop.f32.mrb[5].mxu1  ;;  %vm794_vm2 = vcmp.eq.s32.totalorder %v1631_v63, %v792_v29 }
 0x28b   : > { %v711_v32 = vsel %vm709_vm9, %v695_v26, -inf  ;;  %v691_v33 = vpop.f32.mrb[6].mxu1  ;;  %vm808_vm9 = vcmp.eq.s32.totalorder %v1631_v63, %v806_v44 }
 0x28c   : > { %v696_v34 = vsel %vm1926_vm6, -10000000.0, %v691_v33  ;;  %v1100_v37 = vpop.f32.mrb[7].mxu1  ;;  %v725_v4 = vsel %vm723_vm7, %v695_v26, %v711_v32 }
 0x28d   : > { %v712_v39 = vsel %vm710_vm11, %v696_v34, -inf  ;;  %v739_v42 = vsel %vm737_vm5, %v695_v26, %v725_v4  ;;  %vm1927_vm11 = vcmask 130048  }
 0x28e   : > { %v726_v43 = vsel %vm724_vm13, %v696_v34, %v712_v39  ;;  %v753_v47 = vsel %vm751_vm0, %v695_v26, %v739_v42  ;;  %vm1928_vm7 = vmmov %vm1927_vm11 }
 0x28f   : > { %v740_v7 = vsel %vm738_vm12, %v696_v34, %v726_v43  ;;  %v767_v48 = vsel %vm765_vm15, %v695_v26, %v753_v47  ;;  %vm1929_vm13 = vmmov %vm1928_vm7 }
 0x290   : > { %v754_v50 = vsel %vm752_vm1, %v696_v34, %v740_v7  ;;  %v781_v51 = vsel %vm779_vm10, %v695_v26, %v767_v48  ;;  %vm1930_vm5 = vmmov %vm1928_vm7  ;;  %vm1934_vm1 = vcmask 261120   ;;  %vm892_vm10 = vcmask 523520  }
 0x291   : > { %v768_v52 = vsel %vm766_vm3, %v696_v34, %v754_v50  ;;  %v795_v53 = vsel %vm793_vm14, %v695_v26, %v781_v51  ;;  %vm1931_vm6 = vmmov %vm1930_vm5 }
 0x292   : > { %v782_v54 = vsel %vm780_vm4, %v696_v34, %v768_v52  ;;  %v809_v2 = vsel %vm807_vm8, %v695_v26, %v795_v53  ;;  %vm1932_vm12 = vmmov %vm1930_vm5 }
 0x293   : > { %v811_v14 = vsel %vm1927_vm11, %v809_v2, -inf  ;;  %v796_v21 = vsel %vm794_vm2, %v696_v34, %v782_v54  ;;  %v563_v45 = vsel %vm1932_vm12, %v1766_v61, 0.0  ;;  %vm1933_vm0 = vmmov %vm1930_vm5 }
 0x294   : > { %812 = vmax.xlane.f32.xlu1 %v811_v14  ;;  %v810_v55 = vsel %vm808_vm9, %v696_v34, %v796_v21  ;;  %v566_v59 = vsel %vm1933_vm0, %v1768_v46, 0.0  ;;  %vm1935_vm15 = vmmov %vm1934_vm1 }
 0x295   : > { %v814_v17 = vsel %vm1928_vm7, %v810_v55, -inf }
 0x296   : > { %815 = vmax.xlane.f32.xlu0 %v814_v17 }
 0x321   : > { %v813_v56 = vpop.xlane.xlu1 %812 }
 0x322   : > { %v817_v57 = vsub.f32 %v809_v2, %v813_v56 }
 0x323   : > { %v816_v23 = vpop.xlane.xlu0 %815 }
 0x324   : > { %v819_v28 = vmul.f32 1.442695, %v817_v57  ;;  %v818_v31 = vsub.f32 %v810_v55, %v816_v23 }
 0x326   : > { %1210 = vpow2.f32 %v819_v28  ;;  %v821_v35 = vmul.f32 1.442695, %v818_v31 }
 0x328   : > { %1212 = vpow2.f32 %v821_v35 }
 0x330   : > { %v1211_v63 = vpop.eup %1210 }
 0x331   : > { %v823_v36 = vsel %vm1929_vm13, %v1211_v63, 0.0 }
 0x332   : > { %v1213_v40 = vpop.eup %1212  ;;  %824 = vadd.xlane.f32.xlu0 %v823_v36 }
 0x333   : > { %v826_v41 = vsel %vm1930_vm5, %v1213_v40, 0.0  ;;  %v829_v58 = vpack.c.bf16 %v1213_v40, %v1211_v63 }
 0x334   : > { %827 = vadd.xlane.f32.xlu1 %v826_v41 }
 0x335   : > { %1104 = vmatmul.mubr.msk.bf16.vlgmr.msra.gmra.mrb[4].mxu0 %vm1931_vm6, %v829_v58 }
 0x336   : > { %564 = vadd.xlane.f32.xlu0 %v563_v45 }
 0x338   : > { %567 = vadd.xlane.f32.xlu1 %v566_v59 }
 0x3bf   : > { %v825_v60 = vpop.xlane.xlu0 %824 }
 0x3c1   : > { %v828_v49 = vpop.xlane.xlu1 %827 }
 0x3c3   : > { %v565_v62 = vpop.xlane.xlu0 %564 }
 0x3c4   : > { %1214 = vrcp.f32 %v565_v62 }
 0x3c5   : > { %v568_v5 = vpop.xlane.xlu1 %567 }
 0x3c6   : > { %1216 = vrcp.f32 %v568_v5 }
 0x3c7   : > { %1218 = vrcp.f32 %v825_v60 }
 0x3c8   : > { %1220 = vrcp.f32 %v828_v49 }
 0x3ce   : > { %v1215_v3 = vpop.eup %1214 }
 0x3cf   : > { %v622_v6 = vmul.f32 %v1215_v3, %v1778_v18 }
 0x3d0   : > { %v1217_v8 = vpop.eup %1216 }
 0x3d1   : > { %v623_v61 = vmul.f32 %v1217_v8, %v1780_v20  ;;  %624 = vst.msk [vmem:[%s276_s9] sm:$0xff] %vm1934_vm1, %v622_v6  ;;  %v1219_v46 = vpop.eup %1218 }
 0x3d2   : > { %v1221_v11 = vpop.eup %1220 }
 0x3d3   : > { %625 = vst.msk [vmem:[%s276_s9 + $0x8] sm:$0xff] %vm1935_vm15, %v623_v61 }
 0x408   : > { %v873_v9 = vpop.f32.mrb[4].mxu0 }
 0x409   : > { %v882_v1 = vmul.f32 %v1219_v46, %v873_v9  ;;  %v1105_v10 = vpop.f32.mrb[5].mxu0 }
 0x40a   : > { %v876_v12 = vpop.f32.mrb[6].mxu0 }
 0x40b   : > { %v883_v13 = vmul.f32 %v1221_v11, %v876_v12  ;;  %886 = vrot.lane.b32.xlu0 %v882_v1, %s1325_s17  ;;  %v1106_v15 = vpop.f32.mrb[7].mxu0 }
 0x40d   : > { %888 = vrot.lane.b32.xlu1 %v883_v13, %s1325_s17 }
 0x47d   : > { %v887_v16 = vpop.permute.xlu0 %886 }
 0x47e   : > { %893 = vst.msk [vmem:[%s276_s9] sm:$0xff] %vm892_vm10, %v887_v16 }
 0x47f   : > { %v889_v18 = vpop.permute.xlu1 %888 }
 0x480   : > { %894 = vst.msk [vmem:[%s276_s9 + $0x8] sm:$0xff] %vm892_vm10, %v889_v18 }
 0x481   : > { %1245 = shalt.err (!%p1242_p3)
}
 0x482   : > { %s1246_s20 = scalar_lea.hbm %s1825_s23, 256  ;;  %s1250_s22 = scalar_lea.hbm %s1882_s5, 512 }
 0x483   : > { %p1247_p4 = scmp.ne.s32.totalorder %s1825_s23, %s1246_s20  ;;  %p1251_p8 = scmp.lt.u32.totalorder %s1825_s23, %s1882_s5 }
 0x484   : > { %p1252_p9 = scmp.lt.u32.totalorder %s1250_s22, %s1246_s20  ;;  %p1254_p12 = scmp.lt.u32.totalorder %s1246_s20, %s1825_s23 }
 0x485   : > { %p1248_p5 = pnand %p1247_p4, %p1411_p7 }
 0x486   : > { %p1253_p10 = por %p1252_p9, %p1251_p8 }
 0x487   : > { %p1249_p6 = pneg %p1248_p5 }
 0x488   : > { %p1255_p13 = por %p1254_p12, %p1253_p10 }
 0x48a   : > { %p1256_p0 = pnand %p1255_p13, %p1249_p6 }
 0x48c   : > { %1259 = shalt.err (!%p1256_p0)
}
 0x48d   : > { %s1327_s17 = smov 128   ;;  %s1328_s13 = smov 8  }
 0x48e   : > { %1107 = dma.vmem_to_hbm [thread:$0]  (%p1411_p7), %s1827_s18, 256, %s1825_s23, %s1831_s25, %s1327_s17, %s1327_s17, %s1328_s13  }
 0x48f PF: > { %p1113_p1 = scmp.ge.s32.totalorder %s1312_s8, 2  ;;  %s926_s19 = sand.u32 1, %s1292_s28  }
 0x490   : > { %s927_s24 = scalar_lea.sflag [#allocation5], %s926_s19 }
 0x491   : > { %p1110_p2 = pnand %p1113_p1, %p1418_p11 }
 0x493   : > { %1287 = dma.done.wait (!%p1110_p2), %s927_s24, 256  }
 0x494   : > { %1289 = vsyncadd (!%p1110_p2), %s927_s24, 4294967040  ;;  %s22_s8 = sadd.s32 1, %s1312_s8   ;;  %s1936_s28 = smov %s1296_s29 }
 0x495   : > { %p19_p3 = scmp.ge.s32.totalorder %s22_s8, 4   ;;  %s1937_s29 = smov %s1300_s30 }
 0x496   : > { %s1938_s30 = smov %s1424_s15  ;;  %s1939_s6 = smov %s1308_s7 }
 0x497   : > { %s1940_s7 = smov %s1942_s10  ;;  %21 = sbr.rel (!%p19_p3) target bundleno = 16 (0x10), region = 84 }
 0x49e   :  { %932 = vsyncpa [#allocation5], 1 }
 0x49f   :  { %934 = vsyncpa [#allocation5 + $0x1], 1 }

</bundles_post_ra>
